<compile_context>
chip_gen: v5e
topology: v5e:2x2
jax: 0.10.0
libtpu: 0.0.40
codegen_flags: <defaults>
</compile_context>

<pallas_src>
import jax
import jax.numpy as jnp
from jax import lax
from jax.experimental import pallas as pl
from jax.experimental.pallas import tpu as pltpu

EPS = 1e-5  # RevIN eps


def revin_linear_kernel(x_ref, w_ref, b_ref, aw_ref, ab_ref, iaw_ref, o_ref):
    # x_ref  : (L, TN)  time x (batch*channel) slab           [lane-dense]
    # w_ref  : (P, L)   nn.Linear weight (pred_len, seq_len)
    # b_ref  : (P, 1)   nn.Linear bias as a column (broadcast over lanes)
    # aw_ref : (1, TN)  RevIN affine weight, tiled over batch
    # ab_ref : (1, TN)  RevIN affine bias, tiled over batch
    # iaw_ref: (1, TN)  1 / (affine_weight + eps^2), precomputed in the wrapper
    # o_ref  : (P, TN)  output slab
    x = x_ref[...]                                              # (L, TN) f32

    # --- RevIN 'norm': per-column stats over the time axis ---
    mean = jnp.mean(x, axis=0, keepdims=True)                   # (1, TN)
    var = jnp.mean((x - mean) * (x - mean), axis=0, keepdims=True)  # unbiased=False
    stdev = jnp.sqrt(var + EPS)                                 # (1, TN) (kept for denorm)
    inv_std = lax.rsqrt(var + EPS)                              # EUP; avoids (L,TN) divide

    aw = aw_ref[...]                                            # (1, TN)
    ab = ab_ref[...]                                            # (1, TN)
    xn = (x - mean) * inv_std * aw + ab                         # (L, TN) pure VPU muls

    # --- Linear over time: y[p, n] = sum_l W[p, l] * xn[l, n] + b[p] ---
    y = jnp.dot(w_ref[...], xn, preferred_element_type=jnp.float32)  # (P, TN) on MXU
    y = y + b_ref[...]                                          # (P, 1) broadcast

    # --- RevIN 'denorm' (reciprocal of affine weight hoisted to wrapper) ---
    y = (y - ab) * iaw_ref[...]
    o_ref[...] = y * stdev + mean                               # (P, TN)


def _pick_tn(n, max_tn=512):
    """Lane-axis tile: full width if small; else largest multiple of 128 <= max_tn dividing n."""
    if n <= max_tn:
        return n
    for t in range(max_tn, 127, -128):
        if n % t == 0:
            return t
    return n  # fallback: single block


def revin_linear(x, w, lin_bias, affine_weight, affine_bias):
    B, L, C = x.shape
    P = w.shape[0]
    N = B * C

    # Lane-dense layout plumbing (wrapper side): column index = b*C + c.
    x2d = jnp.transpose(x, (1, 0, 2)).reshape(L, N)             # (L, B*C)
    aw = jnp.tile(affine_weight, B).reshape(1, N)
    ab = jnp.tile(affine_bias, B).reshape(1, N)
    iaw = jnp.tile(1.0 / (affine_weight + EPS * EPS), B).reshape(1, N)
    b = lin_bias.reshape(P, 1)

    tn = _pick_tn(N)
    grid = (N // tn,)

    y2d = pl.pallas_call(
        revin_linear_kernel,
        out_shape=jax.ShapeDtypeStruct((P, N), jnp.float32),
        grid_spec=pltpu.PrefetchScalarGridSpec(
            num_scalar_prefetch=0,
            grid=grid,
            in_specs=[
                pl.BlockSpec((L, tn), lambda n: (0, n)),   # x slab (lane-tiled)
                pl.BlockSpec((P, L), lambda n: (0, 0)),    # Linear weight (resident)
                pl.BlockSpec((P, 1), lambda n: (0, 0)),    # Linear bias column (resident)
                pl.BlockSpec((1, tn), lambda n: (0, n)),   # RevIN affine weight
                pl.BlockSpec((1, tn), lambda n: (0, n)),   # RevIN affine bias
                pl.BlockSpec((1, tn), lambda n: (0, n)),   # 1/(affine weight + eps^2)
            ],
            out_specs=pl.BlockSpec((P, tn), lambda n: (0, n)),
        ),
        compiler_params=pltpu.CompilerParams(
            dimension_semantics=("parallel",)),
    )(x2d, w, b, aw, ab, iaw)

    # (P, B*C) -> (B, P, C), matching the PyTorch module's output layout.
    return jnp.transpose(y2d.reshape(P, B, C), (1, 0, 2))


def reference(x, w, lin_bias, affine_weight, affine_bias):
    # Pure-JAX reference mirroring the PyTorch RevIN-Linear forward.
    mean = jnp.mean(x, axis=1, keepdims=True)                      # (B, 1, C)
    stdev = jnp.sqrt(jnp.var(x, axis=1, keepdims=True) + EPS)      # unbiased=False
    xn = (x - mean) / stdev * affine_weight + affine_bias          # (B, L, C)
    y = jnp.einsum("blc,pl->bpc", xn, w) + lin_bias[None, :, None]  # (B, P, C)
    y = (y - affine_bias) / (affine_weight + EPS * EPS)
    return y * stdev + mean


if __name__ == "__main__":
    B, L, C, P = 2, 16, 4, 8   # batch, seq_len, enc_in, pred_len

    key = jax.random.PRNGKey(0)
    kx, kw, kb = jax.random.split(key, 3)

    x = jax.random.normal(kx, (B, L, C), dtype=jnp.float32)

    # nn.Linear(seq_len, pred_len) init: uniform(-1/sqrt(L), 1/sqrt(L))
    bound = 1.0 / (L ** 0.5)
    w = jax.random.uniform(kw, (P, L), minval=-bound, maxval=bound, dtype=jnp.float32)
    lin_bias = jax.random.uniform(kb, (P,), minval=-bound, maxval=bound, dtype=jnp.float32)

    # RevIN affine params: weight=1, bias=0 (as in RevIN.__init__); perturb to exercise paths
    affine_weight = jnp.ones((C,), dtype=jnp.float32) * 1.1
    affine_bias = jnp.ones((C,), dtype=jnp.float32) * 0.05

    out = revin_linear(x, w, lin_bias, affine_weight, affine_bias)
    out = jax.block_until_ready(out)

    ref = reference(x, w, lin_bias, affine_weight, affine_bias)
    assert out.shape == (B, P, C)
    assert jnp.allclose(out, ref, atol=1e-4, rtol=1e-4), "mismatch vs reference"

    print("KERNEL_OK")
</pallas_src>

<mosaic_0001>
module attributes {stable_mosaic.version = 11 : i64} {
  func.func @revin_linear_kernel(%arg0: i32, %arg1: memref<16x8xf32, #tpu.memory_space<vmem>>, %arg2: memref<8x16xf32, #tpu.memory_space<vmem>>, %arg3: memref<8x1xf32, #tpu.memory_space<vmem>>, %arg4: memref<1x8xf32, #tpu.memory_space<vmem>>, %arg5: memref<1x8xf32, #tpu.memory_space<vmem>>, %arg6: memref<1x8xf32, #tpu.memory_space<vmem>>, %arg7: memref<8x8xf32, #tpu.memory_space<vmem>>) attributes {dimension_semantics = [#tpu.dimension_semantics<parallel>], iteration_bounds = array<i64: 1>, scalar_prefetch = 0 : i64, scratch_operands = 0 : i64, tpu.core_type = #tpu.core_type<tc>, window_params = [{transform_indices = @transform_0, window_bounds = array<i64: 16, 8>}, {pipeline_mode = #tpu.pipeline_mode<synchronous>, transform_indices = @transform_1, window_bounds = array<i64: 8, 16>}, {pipeline_mode = #tpu.pipeline_mode<synchronous>, transform_indices = @transform_2, window_bounds = array<i64: 8, 1>}, {transform_indices = @transform_3, window_bounds = array<i64: 1, 8>}, {transform_indices = @transform_4, window_bounds = array<i64: 1, 8>}, {transform_indices = @transform_5, window_bounds = array<i64: 1, 8>}, {transform_indices = @transform_6, window_bounds = array<i64: 8, 8>}]} {
    %c0 = arith.constant 0 : index
    %c0_0 = arith.constant 0 : index
    %0 = vector.load %arg1[%c0, %c0_0] : memref<16x8xf32, #tpu.memory_space<vmem>>, vector<16x8xf32>
    %cst = arith.constant dense<0.000000e+00> : vector<8xf32>
    %1 = vector.multi_reduction <add>, %0, %cst [0] : vector<16x8xf32> to vector<8xf32>
    %2 = vector.shape_cast %1 : vector<8xf32> to vector<1x8xf32>
    %cst_1 = arith.constant 1.600000e+01 : f32
    %3 = vector.broadcast %cst_1 : f32 to vector<1x8xf32>
    %4 = arith.divf %2, %3 : vector<1x8xf32>
    %5 = vector.broadcast %4 : vector<1x8xf32> to vector<16x8xf32>
    %6 = arith.subf %0, %5 : vector<16x8xf32>
    %7 = vector.broadcast %4 : vector<1x8xf32> to vector<16x8xf32>
    %8 = arith.subf %0, %7 : vector<16x8xf32>
    %9 = arith.mulf %6, %8 : vector<16x8xf32>
    %cst_2 = arith.constant dense<0.000000e+00> : vector<8xf32>
    %10 = vector.multi_reduction <add>, %9, %cst_2 [0] : vector<16x8xf32> to vector<8xf32>
    %11 = vector.shape_cast %10 : vector<8xf32> to vector<1x8xf32>
    %cst_3 = arith.constant 1.600000e+01 : f32
    %12 = vector.broadcast %cst_3 : f32 to vector<1x8xf32>
    %13 = arith.divf %11, %12 : vector<1x8xf32>
    %cst_4 = arith.constant 9.99999974E-6 : f32
    %14 = vector.broadcast %cst_4 : f32 to vector<1x8xf32>
    %15 = arith.addf %13, %14 : vector<1x8xf32>
    %16 = math.sqrt %15 : vector<1x8xf32>
    %cst_5 = arith.constant 9.99999974E-6 : f32
    %17 = vector.broadcast %cst_5 : f32 to vector<1x8xf32>
    %18 = arith.addf %13, %17 : vector<1x8xf32>
    %19 = math.rsqrt %18 : vector<1x8xf32>
    %c0_6 = arith.constant 0 : index
    %c0_7 = arith.constant 0 : index
    %20 = vector.load %arg4[%c0_6, %c0_7] : memref<1x8xf32, #tpu.memory_space<vmem>>, vector<1x8xf32>
    %c0_8 = arith.constant 0 : index
    %c0_9 = arith.constant 0 : index
    %21 = vector.load %arg5[%c0_8, %c0_9] : memref<1x8xf32, #tpu.memory_space<vmem>>, vector<1x8xf32>
    %22 = vector.broadcast %4 : vector<1x8xf32> to vector<16x8xf32>
    %23 = arith.subf %0, %22 : vector<16x8xf32>
    %24 = vector.broadcast %19 : vector<1x8xf32> to vector<16x8xf32>
    %25 = arith.mulf %23, %24 : vector<16x8xf32>
    %26 = vector.broadcast %20 : vector<1x8xf32> to vector<16x8xf32>
    %27 = arith.mulf %25, %26 : vector<16x8xf32>
    %28 = vector.broadcast %21 : vector<1x8xf32> to vector<16x8xf32>
    %29 = arith.addf %27, %28 : vector<16x8xf32>
    %c0_10 = arith.constant 0 : index
    %c0_11 = arith.constant 0 : index
    %30 = vector.load %arg2[%c0_10, %c0_11] : memref<8x16xf32, #tpu.memory_space<vmem>>, vector<8x16xf32>
    %cst_12 = arith.constant dense<0.000000e+00> : vector<8x8xf32>
    %31 = tpu.matmul %30, %29, %cst_12 {dimension_numbers = #tpu.dot_dimension_numbers<[1], [0], [0], [1], [0, 0, 1, 1], [], []>} : vector<8x16xf32>, vector<16x8xf32>, vector<8x8xf32> -> vector<8x8xf32>
    %c0_13 = arith.constant 0 : index
    %c0_14 = arith.constant 0 : index
    %32 = vector.load %arg3[%c0_13, %c0_14] : memref<8x1xf32, #tpu.memory_space<vmem>>, vector<8x1xf32>
    %33 = vector.broadcast %32 : vector<8x1xf32> to vector<8x8xf32>
    %34 = arith.addf %31, %33 : vector<8x8xf32>
    %35 = vector.broadcast %21 : vector<1x8xf32> to vector<8x8xf32>
    %36 = arith.subf %34, %35 : vector<8x8xf32>
    %c0_15 = arith.constant 0 : index
    %c0_16 = arith.constant 0 : index
    %37 = vector.load %arg6[%c0_15, %c0_16] : memref<1x8xf32, #tpu.memory_space<vmem>>, vector<1x8xf32>
    %38 = vector.broadcast %37 : vector<1x8xf32> to vector<8x8xf32>
    %39 = arith.mulf %36, %38 : vector<8x8xf32>
    %40 = vector.broadcast %16 : vector<1x8xf32> to vector<8x8xf32>
    %41 = arith.mulf %39, %40 : vector<8x8xf32>
    %42 = vector.broadcast %4 : vector<1x8xf32> to vector<8x8xf32>
    %43 = arith.addf %41, %42 : vector<8x8xf32>
    %c0_17 = arith.constant 0 : index
    %c0_18 = arith.constant 0 : index
    %44 = vector.load %arg7[%c0_17, %c0_18] : memref<8x8xf32, #tpu.memory_space<vmem>>, vector<8x8xf32>
    tpu.vector_store %arg7[%c0_17, %c0_18], %43 {strides = array<i32>} : memref<8x8xf32, #tpu.memory_space<vmem>>, vector<8x8xf32>,
    return
  }
  func.func @transform_0(%arg0: i32) -> (i32, i32) {
    %c0_i32 = arith.constant 0 : i32
    %c0_i32_0 = arith.constant 0 : i32
    return %c0_i32, %arg0 : i32, i32
  }
  func.func @transform_1(%arg0: i32) -> (i32, i32) {
    %c0_i32 = arith.constant 0 : i32
    %c0_i32_0 = arith.constant 0 : i32
    %c0_i32_1 = arith.constant 0 : i32
    return %c0_i32, %c0_i32_0 : i32, i32
  }
  func.func @transform_2(%arg0: i32) -> (i32, i32) {
    %c0_i32 = arith.constant 0 : i32
    %c0_i32_0 = arith.constant 0 : i32
    %c0_i32_1 = arith.constant 0 : i32
    return %c0_i32, %c0_i32_0 : i32, i32
  }
  func.func @transform_3(%arg0: i32) -> (i32, i32) {
    %c0_i32 = arith.constant 0 : i32
    %c0_i32_0 = arith.constant 0 : i32
    return %c0_i32, %arg0 : i32, i32
  }
  func.func @transform_4(%arg0: i32) -> (i32, i32) {
    %c0_i32 = arith.constant 0 : i32
    %c0_i32_0 = arith.constant 0 : i32
    return %c0_i32, %arg0 : i32, i32
  }
  func.func @transform_5(%arg0: i32) -> (i32, i32) {
    %c0_i32 = arith.constant 0 : i32
    %c0_i32_0 = arith.constant 0 : i32
    return %c0_i32, %arg0 : i32, i32
  }
  func.func @transform_6(%arg0: i32) -> (i32, i32) {
    %c0_i32 = arith.constant 0 : i32
    %c0_i32_0 = arith.constant 0 : i32
    return %c0_i32, %arg0 : i32, i32
  }
}

</mosaic_0001>

<bundles_post_ra>
// kernel: tpu_custom_call.1
= control target key start
LH: loop header
LB: loop body
LE: loop exit
PB: predicated region body
PF: predicated region fallthrough
CT: control target
= control target key end

     0   :  { %vm26_vm0 = vcmask 64512   ;;  %v189_v4 = vmov 16.0   ;;  %s256_s0 = inlined_call_operand.vmem [shape: f32[16,8], index: 0, kind: input, shape index: {}]   ;;  %s257_s1 = inlined_call_operand.vmem [shape: f32[8,16], index: 1, kind: input, shape index: {}]   ;;  %s258_s2 = inlined_call_operand.vmem [shape: f32[8,1], index: 2, kind: input, shape index: {}]   ;;  %s259_s3 = inlined_call_operand.vmem [shape: f32[1,8], index: 3, kind: input, shape index: {}]   ;;  %s260_s4 = inlined_call_operand.vmem [shape: f32[1,8], index: 4, kind: input, shape index: {}]   ;;  %s261_s5 = inlined_call_operand.vmem [shape: f32[1,8], index: 5, kind: input, shape index: {}]   ;;  %s262_s6 = inlined_call_operand.hbm [shape: f32[8,8], index: 6, kind: output, shape index: {}]  }
   0x1   :  { %v24_v0 = vld [vmem:[%s256_s0] sm:$0xff]  ;;  %v25_v1 = vld [vmem:[%s256_s0 + $0x8] sm:$0xff]  ;;  %159 = vrcp.f32 %v189_v4 }
   0x2   :  { %v27_v2 = vsel %vm26_vm0, %v24_v0, 0.0  ;;  %v28_v3 = vsel %vm26_vm0, %v25_v1, 0.0 }
   0x3   :  { %v29_v5 = vadd.f32 %v28_v3, %v27_v2 }
   0x4   :  { %11 = vsyncpa [#allocation3], 0  ;;  %v96_v32 = vld [vmem:[%s258_s2] sm:$0xff]  ;;  %v190_v34 = vmov 0   ;;  %vm102_vm5 = vcmask 130048   ;;  %s191_s7 = smov [#allocation2]  }
   0x5   :  { %v30_v6 = vrot.slane %v29_v5, 4  ;;  %155 = vset.pattern.permute.xlu0 %v190_v34  ;;  %v156_v42 = vld [vmem:[%s259_s3] ss:$0 sm:$0xff]  ;;  %s142_s10 = sshll.u32 %s262_s6, 4  ;;  %s143_s10 = int_to_ptr.hbm [resolvable:$true] %s142_s10 }
   0x6   :  { %99 = vperm.xlu0 %155, %v96_v32   ;;  %v157_v45 = vld [vmem:[%s260_s4] ss:$0 sm:$0xff] }
   0x7   :  { %v31_v7 = vadd.f32 %v30_v6, %v29_v5  ;;  %v160_v8 = vpop.eup %159  ;;  %v95_v51 = vld [vmem:[%s257_s1] sm:$0xff]  ;;  %s140_s1 = sshll.u32 %s191_s7, 4  ;;  %s141_s1 = int_to_ptr.vmem [resolvable:$true] %s140_s1 }
   0x8   :  { %v37_v10 = vmul.f32 16.0, %v160_v8  ;;  %vm41_vm1 = vweird.f32 %v160_v8  ;;  %v158_v58 = vld [vmem:[%s261_s5] ss:$0 sm:$0xff] }
   0x9   :  { %v32_v9 = vrot.slane %v31_v7, 2 }
   0xa   :  { %v38_v12 = vsub.f32 1.0, %v37_v10 }
   0xb   :  { %v33_v11 = vadd.f32 %v32_v9, %v31_v7 }
   0xc   :  { %v39_v14 = vmul.f32 %v160_v8, %v38_v12 }
   0xd   :  { %v34_v13 = vrot.slane %v33_v11, 1 }
   0xe   :  { %v40_v16 = vadd.f32 %v160_v8, %v39_v14 }
   0xf   :  { %v35_v15 = vadd.f32 %v34_v13, %v33_v11 }
  0x10   :  { %v42_v17 = vsel %vm41_vm1, %v160_v8, %v40_v16 }
  0x11   :  { %v43_v18 = vmul.f32 %v42_v17, %v35_v15 }
  0x13   :  { %v44_v19 = vsub.f32 %v24_v0, %v43_v18  ;;  %v45_v20 = vsub.f32 %v25_v1, %v43_v18 }
  0x15   :  { %v46_v21 = vmul.f32 %v44_v19, %v44_v19  ;;  %v47_v22 = vmul.f32 %v45_v20, %v45_v20 }
  0x17   :  { %v48_v23 = vsel %vm26_vm0, %v46_v21, 0.0  ;;  %v49_v24 = vsel %vm26_vm0, %v47_v22, 0.0 }
  0x18   :  { %v50_v25 = vadd.f32 %v49_v24, %v48_v23 }
  0x1a   :  { %v51_v26 = vrot.slane %v50_v25, 4 }
  0x1c   :  { %v52_v27 = vadd.f32 %v51_v26, %v50_v25 }
  0x1e   :  { %v53_v28 = vrot.slane %v52_v27, 2 }
  0x20   :  { %v54_v29 = vadd.f32 %v53_v28, %v52_v27 }
  0x22   :  { %v55_v30 = vrot.slane %v54_v29, 1 }
  0x24   :  { %v56_v31 = vadd.f32 %v55_v30, %v54_v29 }
  0x26   :  { %v57_v33 = vmul.f32 %v56_v31, %v42_v17 }
  0x28   :  { %v58_v35 = vadd.f32 1e-05, %v57_v33 }
  0x2a   :  { %161 = vrsqrt.f32 %v58_v35  ;;  %vm77_vm2 = vweird.f32 %v58_v35  ;;  %vm66_vm6 = vcmp.eq.f32.partialorder %v58_v35, inf  ;;  %v69_v54 = vand.u32 2147483648, %v58_v35 }
  0x2b   :  { %vm68_vm7 = vcmp.eq.f32.partialorder %v58_v35, 0.0 }
  0x30   :  { %v162_v36 = vpop.eup %161 }
  0x31   :  { %v60_v37 = vmul.f32 %v162_v36, %v58_v35  ;;  %vm78_vm3 = vweird.f32 %v162_v36 }
  0x32   :  { %vm79_vm4 = vmor %vm77_vm2, %vm78_vm3 }
  0x33   :  { %v61_v38 = vmul.f32 %v162_v36, %v60_v37 }
  0x35   :  { %v62_v39 = vmul.f32 0.5, %v61_v38 }
  0x37   :  { %v63_v40 = vsub.f32 1.5, %v62_v39 }
  0x39   :  { %v64_v41 = vmul.f32 %v162_v36, %v63_v40 }
  0x3b   :  { %v80_v43 = vsel %vm79_vm4, %v162_v36, %v64_v41  ;;  %v65_v52 = vmul.f32 %v64_v41, %v58_v35 }
  0x3c   :  { %v84_v44 = vmul.f32 %v80_v43, %v45_v20  ;;  %v83_v46 = vmul.f32 %v80_v43, %v44_v19 }
  0x3d   :  { %v67_v56 = vsel %vm66_vm6, %v58_v35, %v65_v52 }
  0x3e   :  { %v89_v47 = vmul.f32 %v156_v42, %v84_v44  ;;  %v88_v48 = vmul.f32 %v156_v42, %v83_v46  ;;  %v70_v60 = vsel %vm68_vm7, %v69_v54, %v67_v56 }
  0x40   :  { %v94_v49 = vadd.f32 %v157_v45, %v89_v47  ;;  %v93_v50 = vadd.f32 %v157_v45, %v88_v48 }
  0x42   :  { %120 = vmatpush.msra.mxu0 %v94_v49 }
  0x44   :  { %121 = vmatpush.msra.mxu0 %v93_v50 }
  0x45   :  { %151 = vmatmul.msk.f32.vlgmr.msra.gmra.mxu0 %vm102_vm5, %v95_v51 }
  0x78   :  { %v100_v53 = vpop.permute.xlu0 %99 }
  0xc2   :  { %v123_v55 = vpop.f32.mrf.mxu0 }
  0xc3   :  { %v124_v57 = vadd.f32 %v123_v55, %v100_v53 }
  0xc5   :  { %v126_v59 = vsub.f32 %v124_v57, %v157_v45 }
  0xc7   :  { %v131_v61 = vmul.f32 %v158_v58, %v126_v59 }
  0xc9   :  { %v132_v62 = vmul.f32 %v131_v61, %v70_v60 }
  0xcb   :  { %v133_v63 = vadd.f32 %v132_v62, %v43_v18 }
  0xcd   :  { %134 = vst.msk [vmem:[#allocation2] sm:$0xff] %vm26_vm0, %v133_v63 }
  0xce   :  { %145 = dma.vmem_to_hbm [thread:$0]  %s141_s1, 128, %s143_s10, [#allocation3]  }
  0xcf   :  { %187 = dma.done.wait [#allocation3], 128  }
  0xd0   :  { %188 = vsyncadd [#allocation3], 4294967168 }
  0xd1   :  { %150 = vsyncpa [#allocation3], 1 }

</bundles_post_ra>
